<compile_context>
chip_gen: v7x
topology: tpu7x:2x2x1
jax: 0.10.0
libtpu: 0.0.40
codegen_flags: <defaults>
</compile_context>

<pallas_src>
import jax
import jax.numpy as jnp
from jax.experimental import pallas as pl
from jax.experimental.pallas import tpu as pltpu


def logistic_kernel(x_ref, w_ref, b_ref, o_ref):
    # w_ref / b_ref are scalar parameters living in SMEM.
    w = w_ref[0]
    b = b_ref[0]
    # Widen to f32 for compute (v5e has no bf16 VPU/EUP path); the HBM<->VMEM
    # stream stays in the input's native dtype.
    x = x_ref[...].astype(jnp.float32)
    o_ref[...] = jax.nn.sigmoid(x * w + b).astype(o_ref.dtype)


def _tile_params(n):
    """Pick (C, rows, TM): C = lane width (multiple of 128), TM = rows per tile."""
    C = 1024 if n >= 8 * 1024 else 128
    rows = pl.cdiv(n, C)
    if rows <= 8:
        TM = rows  # full-extent row block; no 8-divisibility requirement
    else:
        # Cap tiles at (1024 x 1024) = 4 MiB f32, but keep >= ~4 grid steps
        # when the data allows it so both v7x TensorCores get work.
        TM = min(1024, max(8, ((rows + 3) // 4 + 7) // 8 * 8))
    return C, rows, TM


def _pallas_sigmoid_2d(x2d, w, b, TM, C):
    rows = x2d.shape[0]
    grid = (pl.cdiv(rows, TM),)  # ragged final row-block is auto-masked
    return pl.pallas_call(
        logistic_kernel,
        out_shape=jax.ShapeDtypeStruct((rows, C), x2d.dtype),  # native dtype out
        grid=grid,
        in_specs=[
            pl.BlockSpec((TM, C), lambda i: (i, 0)),            # x tile (VMEM)
            pl.BlockSpec(memory_space=pltpu.MemorySpace.SMEM),  # weight scalar
            pl.BlockSpec(memory_space=pltpu.MemorySpace.SMEM),  # bias scalar
        ],
        out_specs=pl.BlockSpec((TM, C), lambda i: (i, 0)),
        compiler_params=pltpu.CompilerParams(
            # Shard row-tiles across v7x's two TensorCores; no-op on v5e/v6e.
            dimension_semantics=("parallel",),
            # 2x double-buffered 4 MiB tiles (in + out) <= 16 MiB.
            vmem_limit_bytes=32 * 1024 * 1024,
        ),
    )(x2d, w, b)


@jax.jit
def logistic_forward(x, weight, bias):
    """x: (..., 1); weight: (1, 1); bias: (1,). Returns sigmoid(x @ W^T + b)."""
    orig_shape = x.shape
    n = x.size
    if n == 0:  # empty-batch guard: grid=(0,) is not valid
        return jnp.empty(orig_shape, x.dtype)

    w = weight.reshape((1,)).astype(jnp.float32)  # scalar weight -> SMEM
    b = bias.reshape((1,)).astype(jnp.float32)    # scalar bias   -> SMEM

    C, rows, TM = _tile_params(n)
    padded = rows * C

    flat = x.reshape(-1)  # native dtype; dropping the size-1 feature dim is free
    if padded != n:
        # Pad only to the next multiple of the lane width C (<= C-1 elements).
        # TODO(synk): allow_input_fusion could fuse this pad into the
        # pallas_call input and drop this extra HBM pass entirely.
        flat = jnp.pad(flat, (0, padded - n))

    out2d = _pallas_sigmoid_2d(flat.reshape(rows, C), w, b, TM, C)

    out = out2d.reshape(-1)
    if padded != n:
        out = out[:n]
    return out.reshape(orig_shape)


if __name__ == "__main__":
    key = jax.random.PRNGKey(0)
    kw, kb, k1, k2, k3 = jax.random.split(key, 5)

    # Parameters with the same shapes as torch.nn.Linear(1, 1).
    weight = jax.random.uniform(kw, (1, 1), jnp.float32, minval=-1.0, maxval=1.0)
    bias = jax.random.uniform(kb, (1,), jnp.float32, minval=-1.0, maxval=1.0)

    def reference(x):
        # Linear(1, 1) + sigmoid == sigmoid(x * w + b)
        return jax.nn.sigmoid(x * weight[0, 0] + bias[0])

    ok = True
    # batch=8: tiny, C=128 path; batch=3000: ragged (pad/trim + multi-step grid);
    # batch=16384: aligned fast path with C=1024, no pad, no trim.
    for kx, batch in ((k1, 8), (k2, 3000), (k3, 16384)):
        x = jax.random.normal(kx, (batch, 1), dtype=jnp.float32)
        y = jax.block_until_ready(logistic_forward(x, weight, bias))
        y_ref = reference(x)
        ok &= (y.shape == x.shape) and (y.dtype == x.dtype)
        ok &= bool(jnp.allclose(y, y_ref, atol=1e-6, rtol=1e-6))
    assert ok
    print("KERNEL_OK")
</pallas_src>

<mosaic_0001>
module attributes {stable_mosaic.version = 11 : i64} {
  func.func @logistic_kernel(%arg0: i32, %arg1: memref<1x128xf32, #tpu.memory_space<vmem>>, %arg2: memref<1xf32, #tpu.memory_space<smem>>, %arg3: memref<1xf32, #tpu.memory_space<smem>>, %arg4: memref<1x128xf32, #tpu.memory_space<vmem>>) attributes {dimension_semantics = [#tpu.dimension_semantics<parallel>], iteration_bounds = array<i64: 1>, scalar_prefetch = 0 : i64, scratch_operands = 0 : i64, tpu.core_type = #tpu.core_type<tc>, window_params = [{transform_indices = @transform_0, window_bounds = array<i64: 1, 128>}, {transform_indices = @transform_1, window_bounds = array<i64: 1>}, {transform_indices = @transform_2, window_bounds = array<i64: 1>}, {transform_indices = @transform_3, window_bounds = array<i64: 1, 128>}]} {
    %c0 = arith.constant 0 : index
    %0 = memref.load %arg2[%c0] : memref<1xf32, #tpu.memory_space<smem>>
    %c0_0 = arith.constant 0 : index
    %1 = memref.load %arg3[%c0_0] : memref<1xf32, #tpu.memory_space<smem>>
    %c0_1 = arith.constant 0 : index
    %c0_2 = arith.constant 0 : index
    %2 = vector.load %arg1[%c0_1, %c0_2] : memref<1x128xf32, #tpu.memory_space<vmem>>, vector<1x128xf32>
    %3 = vector.broadcast %0 : f32 to vector<1x128xf32>
    %4 = arith.mulf %2, %3 : vector<1x128xf32>
    %5 = vector.broadcast %1 : f32 to vector<1x128xf32>
    %6 = arith.addf %4, %5 : vector<1x128xf32>
    %7 = arith.negf %6 : vector<1x128xf32>
    %8 = math.exp %7 : vector<1x128xf32>
    %cst = arith.constant 1.000000e+00 : f32
    %9 = vector.broadcast %cst : f32 to vector<1x128xf32>
    %10 = arith.addf %9, %8 : vector<1x128xf32>
    %11 = arith.divf %9, %10 : vector<1x128xf32>
    %c0_3 = arith.constant 0 : index
    %c0_4 = arith.constant 0 : index
    %12 = vector.load %arg4[%c0_3, %c0_4] : memref<1x128xf32, #tpu.memory_space<vmem>>, vector<1x128xf32>
    tpu.vector_store %arg4[%c0_3, %c0_4], %11 {strides = array<i32>} : memref<1x128xf32, #tpu.memory_space<vmem>>, vector<1x128xf32>,
    return
  }
  func.func @transform_0(%arg0: i32) -> (i32, i32) {
    %c0_i32 = arith.constant 0 : i32
    %c0_i32_0 = arith.constant 0 : i32
    return %arg0, %c0_i32 : i32, i32
  }
  func.func @transform_1(%arg0: i32) -> i32 {
    %c0_i32 = arith.constant 0 : i32
    %c0_i32_0 = arith.constant 0 : i32
    return %c0_i32 : i32
  }
  func.func @transform_2(%arg0: i32) -> i32 {
    %c0_i32 = arith.constant 0 : i32
    %c0_i32_0 = arith.constant 0 : i32
    return %c0_i32 : i32
  }
  func.func @transform_3(%arg0: i32) -> (i32, i32) {
    %c0_i32 = arith.constant 0 : i32
    %c0_i32_0 = arith.constant 0 : i32
    return %arg0, %c0_i32 : i32, i32
  }
}

</mosaic_0001>

<bundles_post_ra>
// kernel: logistic_forward.1
= control target key start
LH: loop header
LB: loop body
LE: loop exit
PB: predicated region body
PF: predicated region fallthrough
CT: control target
= control target key end

     0   :  { %s71_s0 = inlined_call_operand.vmem [shape: f32[1,128], index: 0, kind: input, shape index: {}]   ;;  %s72_s1 = inlined_call_operand.<no memory space> [shape: f32[1], index: 1, kind: input, shape index: {}]   ;;  %s73_s2 = inlined_call_operand.<no memory space> [shape: f32[1], index: 2, kind: input, shape index: {}]   ;;  %s74_s3 = inlined_call_operand.vmem [shape: f32[1,128], index: 3, kind: output, shape index: {}]  }
   0x1   :  { %v18_v0 = vld [vmem:[%s71_s0] sm:$0x1]  ;;  %v19_v1 = vstv %s72_s1  ;;  %v21_v2 = vstv %s73_s2 }
   0x2   :  { %v20_v3 = vmul.f32 %v19_v1, %v18_v0 }
   0x4   :  { %v22_v4 = vadd.f32 %v21_v2, %v20_v3 }
   0x6   :  { %v34_v5 = vmul.f32 -1.442695, %v22_v4 }
   0x8   :  { %35 = vpow2.f32 %v34_v5 }
  0x12   :  { %v36_v6 = vpop.eup %35 }
  0x13   :  { %v26_v7 = vadd.f32 1.0, %v36_v6 }
  0x15   :  { %37 = vrcp.f32 %v26_v7 }
  0x1f   :  { %v38_v8 = vpop.eup %37 }
  0x20   :  { %29 = vst [vmem:[%s74_s3] sm:$0x1] %v38_v8 }

</bundles_post_ra>
